<compile_context>
chip_gen: v7x
topology: tpu7x:2x2x1
jax: 0.10.0
libtpu: 0.0.40
codegen_flags: <defaults>
</compile_context>

<pallas_src>
import jax
import jax.numpy as jnp
from jax.experimental import pallas as pl
from jax.experimental.pallas import tpu as pltpu


# ---------------------------------------------------------------------------
# Pallas kernel
# ---------------------------------------------------------------------------
def resblock_kernel(x_ref, wb1_ref, wb2_ref, wbs_ref, fold_ref, spread_ref,
                    out_ref, xpad_ref, h1pad_ref):
    """One batch element per grid step.

    x_ref     : (1, H, W*Cin)         bf16  lane-flattened input rows
    wb*_ref   : (3, W*Cin_k, W*Cout)  bf16  block-banded conv weights (per dy)
    fold_ref  : (W*Cout, Cout)        f32   0/1 matrix: lane -> channel fold
    spread_ref: (Cout, W*Cout)        f32   0/1 matrix: channel -> lane spread
    out_ref   : (1, H, W*Cout)        f32   lane-flattened output rows
    xpad_ref  : (H+2, W*Cin)          bf16  scratch, rows 0 / H+1 = zero halo
    h1pad_ref : (H+2, W*Cout)         bf16  scratch, rows 0 / H+1 = zero halo
    """
    _, H, WCo = out_ref.shape
    WCi = x_ref.shape[2]
    cout = fold_ref.shape[1]
    inv_n = 1.0 / float(H * (WCo // cout))        # 1 / (H * W)

    fold = fold_ref[...]
    spread = spread_ref[...]

    # --- stage input rows into the row-padded scratch ------------------------
    # Only the two 1-row halos are zeroed (cheap, and safe if the parallel
    # grid axis is sharded across cores); the interior is fully overwritten.
    xpad_ref[0:1, :] = jnp.zeros((1, WCi), xpad_ref.dtype)
    xpad_ref[H + 1:H + 2, :] = jnp.zeros((1, WCi), xpad_ref.dtype)
    xpad_ref[1:H + 1, :] = x_ref[0]

    def conv3x3(src_ref, wb_ref):
        # 3x3 "same" conv == 3 MXU matmuls against block-banded weights.
        # src_ref: (H+2, W*Cin_k) row-padded activations (bf16).
        acc = jnp.dot(src_ref[0:H, :], wb_ref[0],
                      preferred_element_type=jnp.float32)
        acc = acc + jnp.dot(src_ref[1:H + 1, :], wb_ref[1],
                            preferred_element_type=jnp.float32)
        acc = acc + jnp.dot(src_ref[2:H + 2, :], wb_ref[2],
                            preferred_element_type=jnp.float32)
        return acc                                            # (H, W*Cout) f32

    def instance_norm(h):
        # InstanceNorm2d(affine=False, eps=1e-5): per-channel stats over all
        # H*W positions, one pass (sum and sum-of-squares), f32 throughout.
        s1 = jnp.dot(jnp.sum(h, axis=0, keepdims=True), fold,
                     preferred_element_type=jnp.float32)      # (1, Cout)
        s2 = jnp.dot(jnp.sum(h * h, axis=0, keepdims=True), fold,
                     preferred_element_type=jnp.float32)      # (1, Cout)
        mean = s1 * inv_n
        var = jnp.maximum(s2 * inv_n - mean * mean, 0.0)
        inv_std = jax.lax.rsqrt(var + 1e-5)
        mean_l = jnp.dot(mean, spread,
                         preferred_element_type=jnp.float32)  # (1, W*Cout)
        inv_l = jnp.dot(inv_std, spread,
                        preferred_element_type=jnp.float32)   # (1, W*Cout)
        return (h - mean_l) * inv_l                           # (H, W*Cout) f32

    # conv1 + IN, staged straight into the row-padded scratch feeding conv2.
    h1 = instance_norm(conv3x3(xpad_ref, wb1_ref))
    h1pad_ref[0:1, :] = jnp.zeros((1, WCo), h1pad_ref.dtype)
    h1pad_ref[H + 1:H + 2, :] = jnp.zeros((1, WCo), h1pad_ref.dtype)
    h1pad_ref[1:H + 1, :] = h1.astype(h1pad_ref.dtype)

    h2 = instance_norm(conv3x3(h1pad_ref, wb2_ref))
    hs = instance_norm(conv3x3(xpad_ref, wbs_ref))

    # Residual sum; output block is already lane-flattened -> no final reshape.
    out_ref[0] = (h2 + hs).astype(out_ref.dtype)


# ---------------------------------------------------------------------------
# Wrapper
# ---------------------------------------------------------------------------
def _banded_weights(w_hwio, width):
    """HWIO (3,3,Cin,Cout) -> (3, W*Cin, W*Cout) block-banded per-dy matrices.

    banded[dy, xin*Cin + c, xout*Cout + o] = w[dy, xin - xout + 1, c, o]
    for |xin - xout| <= 1, else 0.  The zero band edges implement the
    width-direction 'same' padding, so only row (height) halos are needed
    at run time.
    """
    kh, kw, cin, cout = w_hwio.shape
    xin = jnp.arange(width)[:, None]
    xout = jnp.arange(width)[None, :]
    dx = xin - xout + 1                                    # (W, W)
    valid = (dx >= 0) & (dx < kw)
    blocks = w_hwio[:, jnp.clip(dx, 0, kw - 1)]            # (3, W, W, Cin, Cout)
    blocks = jnp.where(valid[None, :, :, None, None], blocks, 0.0)
    banded = jnp.transpose(blocks, (0, 1, 3, 2, 4))        # (3, Win, Cin, Wout, Cout)
    return banded.reshape(kh, width * cin, width * cout)


def resblock_forward(x_nchw, w1_hwio, w2_hwio, ws_hwio):
    """x_nchw: (N, Cin, H, W) f32 -> (N, Cout, H, W) f32."""
    N, Cin, H, W = x_nchw.shape
    Cout = w1_hwio.shape[3]
    WCi, WCo = W * Cin, W * Cout

    # Lane-flattened NHWC rows (channels fastest on the lane axis); bf16 for
    # the MXU and halved HBM->VMEM traffic.  Row halos are added in-kernel.
    x_rows = jnp.transpose(x_nchw, (0, 2, 3, 1)).reshape(N, H, WCi)
    x_rows = x_rows.astype(jnp.bfloat16)

    wb1 = _banded_weights(w1_hwio, W).astype(jnp.bfloat16)    # (3, WCi, WCo)
    wb2 = _banded_weights(w2_hwio, W).astype(jnp.bfloat16)    # (3, WCo, WCo)
    wbs = _banded_weights(ws_hwio, W).astype(jnp.bfloat16)    # (3, WCi, WCo)

    # Constant 0/1 matrices used to fold / broadcast per-channel IN statistics
    # with tiny matmuls instead of tile-crossing reshapes.
    chan_of_lane = jnp.arange(WCo) % Cout
    fold = (chan_of_lane[:, None] ==
            jnp.arange(Cout)[None, :]).astype(jnp.float32)    # (WCo, Cout)
    spread = fold.T                                           # (Cout, WCo)

    # TODO(synk): for production decoder shapes (H,W >= 128, C >= 64) add a
    # row-strip grid axis with a 1-row halo so each strip fits v7x's 64 MiB/TC
    # VMEM and both TensorCores are fed even at N=1; the dense banded weights
    # (which scale as (W*C)^2) would then be replaced by per-strip im2col.
    out_rows = pl.pallas_call(
        resblock_kernel,
        out_shape=jax.ShapeDtypeStruct((N, H, WCo), jnp.float32),
        grid_spec=pltpu.PrefetchScalarGridSpec(
            num_scalar_prefetch=0,
            grid=(N,),
            in_specs=[
                pl.BlockSpec((1, H, WCi), lambda n: (n, 0, 0)),
                pl.BlockSpec((3, WCi, WCo), lambda n: (0, 0, 0)),
                pl.BlockSpec((3, WCo, WCo), lambda n: (0, 0, 0)),
                pl.BlockSpec((3, WCi, WCo), lambda n: (0, 0, 0)),
                pl.BlockSpec((WCo, Cout), lambda n: (0, 0)),
                pl.BlockSpec((Cout, WCo), lambda n: (0, 0)),
            ],
            out_specs=pl.BlockSpec((1, H, WCo), lambda n: (n, 0, 0)),
            scratch_shapes=[
                pltpu.VMEM((H + 2, WCi), jnp.bfloat16),   # row-padded input
                pltpu.VMEM((H + 2, WCo), jnp.bfloat16),   # row-padded IN(conv1)
            ],
        ),
        compiler_params=pltpu.CompilerParams(
            dimension_semantics=("parallel",),
            vmem_limit_bytes=32 * 1024 * 1024,
        ),
    )(x_rows, wb1, wb2, wbs, fold, spread)

    out_nhwc = out_rows.reshape(N, H, W, Cout)
    return jnp.transpose(out_nhwc, (0, 3, 1, 2))              # back to NCHW


# ---------------------------------------------------------------------------
# Pure-JAX reference (correctness check only)
# ---------------------------------------------------------------------------
def _conv_ref(x_nhwc, w_hwio):
    return jax.lax.conv_general_dilated(
        x_nhwc, w_hwio, window_strides=(1, 1), padding="SAME",
        dimension_numbers=("NHWC", "HWIO", "NHWC"),
        precision=jax.lax.Precision.HIGHEST)


def _inorm_ref(h_nhwc):
    mean = jnp.mean(h_nhwc, axis=(1, 2), keepdims=True)
    var = jnp.mean((h_nhwc - mean) ** 2, axis=(1, 2), keepdims=True)
    return (h_nhwc - mean) * jax.lax.rsqrt(var + 1e-5)


def resblock_reference(x_nchw, w1, w2, ws):
    x = jnp.transpose(x_nchw, (0, 2, 3, 1))
    h1 = _inorm_ref(_conv_ref(x, w1))
    h2 = _inorm_ref(_conv_ref(h1, w2))
    hs = _inorm_ref(_conv_ref(x, ws))
    return jnp.transpose(h2 + hs, (0, 3, 1, 2))


# ---------------------------------------------------------------------------
# Deterministic parameter construction (synthetic; no checkpoint load)
# ---------------------------------------------------------------------------
def _make_conv_weight(key, cout, cin, scale=0.2):
    # PyTorch conv weight layout is OIHW; spectral_norm divides by the top
    # singular value of the (Cout, Cin*3*3) matrix (folded in here).
    w = jax.random.normal(key, (cout, cin, 3, 3), jnp.float32) * scale
    sigma = jnp.linalg.norm(w.reshape(cout, -1), ord=2)
    w = w / sigma
    return jnp.transpose(w, (2, 3, 1, 0))                     # OIHW -> HWIO


if __name__ == "__main__":
    N, Cin, Cout, H, W = 2, 4, 8, 16, 16

    key = jax.random.PRNGKey(0)
    kx, k1, k2, ks = jax.random.split(key, 4)

    x = jax.random.normal(kx, (N, Cin, H, W), jnp.float32)
    w1 = _make_conv_weight(k1, Cout, Cin)    # conv1   : input_nc -> output_nc
    w2 = _make_conv_weight(k2, Cout, Cout)   # conv2   : output_nc -> output_nc
    ws = _make_conv_weight(ks, Cout, Cin)    # shortcut: input_nc -> output_nc

    out = jax.jit(resblock_forward)(x, w1, w2, ws)
    out = jax.block_until_ready(out)

    # Reference computed in f32 on the same bf16-rounded operands the kernel
    # feeds to the MXU (accumulation + instance-norm are f32 in both paths);
    # the remaining difference is conv2's bf16-staged input and summation
    # order, hence the 2e-2 tolerance.
    q = lambda a: a.astype(jnp.bfloat16).astype(jnp.float32)
    ref = resblock_reference(q(x), q(w1), q(w2), q(ws))

    assert out.shape == (N, Cout, H, W)
    assert jnp.allclose(out, ref, atol=2e-2, rtol=2e-2), (
        "Pallas Resblock mismatch vs reference: max abs err = "
        f"{jnp.max(jnp.abs(out - ref)):.4e}")

    print("KERNEL_OK")
</pallas_src>

<mosaic_0001>
module attributes {stable_mosaic.version = 11 : i64} {
  func.func @resblock_kernel(%arg0: i32, %arg1: memref<1x16x64xbf16, #tpu.memory_space<vmem>>, %arg2: memref<3x64x128xbf16, #tpu.memory_space<vmem>>, %arg3: memref<3x128x128xbf16, #tpu.memory_space<vmem>>, %arg4: memref<3x64x128xbf16, #tpu.memory_space<vmem>>, %arg5: memref<128x8xf32, #tpu.memory_space<vmem>>, %arg6: memref<8x128xf32, #tpu.memory_space<vmem>>, %arg7: memref<1x16x128xf32, #tpu.memory_space<vmem>>, %arg8: memref<18x64xbf16, #tpu.memory_space<vmem>>, %arg9: memref<18x128xbf16, #tpu.memory_space<vmem>>) attributes {dimension_semantics = [#tpu.dimension_semantics<parallel>], iteration_bounds = array<i64: 2>, scalar_prefetch = 0 : i64, scratch_operands = 2 : i64, tpu.core_type = #tpu.core_type<tc>, window_params = [{transform_indices = @transform_0, window_bounds = array<i64: 1, 16, 64>}, {pipeline_mode = #tpu.pipeline_mode<synchronous>, transform_indices = @transform_1, window_bounds = array<i64: 3, 64, 128>}, {pipeline_mode = #tpu.pipeline_mode<synchronous>, transform_indices = @transform_2, window_bounds = array<i64: 3, 128, 128>}, {pipeline_mode = #tpu.pipeline_mode<synchronous>, transform_indices = @transform_3, window_bounds = array<i64: 3, 64, 128>}, {pipeline_mode = #tpu.pipeline_mode<synchronous>, transform_indices = @transform_4, window_bounds = array<i64: 128, 8>}, {pipeline_mode = #tpu.pipeline_mode<synchronous>, transform_indices = @transform_5, window_bounds = array<i64: 8, 128>}, {transform_indices = @transform_6, window_bounds = array<i64: 1, 16, 128>}]} {
    %c0 = arith.constant 0 : index
    %c0_0 = arith.constant 0 : index
    %0 = vector.load %arg5[%c0, %c0_0] : memref<128x8xf32, #tpu.memory_space<vmem>>, vector<128x8xf32>
    %c0_1 = arith.constant 0 : index
    %c0_2 = arith.constant 0 : index
    %1 = vector.load %arg6[%c0_1, %c0_2] : memref<8x128xf32, #tpu.memory_space<vmem>>, vector<8x128xf32>
    %cst = arith.constant 0.000000e+00 : bf16
    %2 = vector.broadcast %cst : bf16 to vector<1x64xbf16>
    %c0_3 = arith.constant 0 : index
    %c0_4 = arith.constant 0 : index
    %3 = vector.load %arg8[%c0_3, %c0_4] : memref<18x64xbf16, #tpu.memory_space<vmem>>, vector<1x64xbf16>
    tpu.vector_store %arg8[%c0_3, %c0_4], %2 {strides = array<i32>} : memref<18x64xbf16, #tpu.memory_space<vmem>>, vector<1x64xbf16>,
    %cst_5 = arith.constant 0.000000e+00 : bf16
    %4 = vector.broadcast %cst_5 : bf16 to vector<1x64xbf16>
    %c17 = arith.constant 17 : index
    %c0_6 = arith.constant 0 : index
    %5 = vector.load %arg8[%c17, %c0_6] : memref<18x64xbf16, #tpu.memory_space<vmem>>, vector<1x64xbf16>
    tpu.vector_store %arg8[%c17, %c0_6], %4 {strides = array<i32>} : memref<18x64xbf16, #tpu.memory_space<vmem>>, vector<1x64xbf16>,
    %c0_7 = arith.constant 0 : index
    %c0_8 = arith.constant 0 : index
    %c0_9 = arith.constant 0 : index
    %6 = vector.load %arg1[%c0_7, %c0_8, %c0_9] : memref<1x16x64xbf16, #tpu.memory_space<vmem>>, vector<1x16x64xbf16>
    %7 = vector.shape_cast %6 : vector<1x16x64xbf16> to vector<16x64xbf16>
    %c1 = arith.constant 1 : index
    %c0_10 = arith.constant 0 : index
    %8 = vector.load %arg8[%c1, %c0_10] : memref<18x64xbf16, #tpu.memory_space<vmem>>, vector<16x64xbf16>
    tpu.vector_store %arg8[%c1, %c0_10], %7 {strides = array<i32>} : memref<18x64xbf16, #tpu.memory_space<vmem>>, vector<16x64xbf16>,
    %c0_11 = arith.constant 0 : index
    %c0_12 = arith.constant 0 : index
    %9 = vector.load %arg8[%c0_11, %c0_12] : memref<18x64xbf16, #tpu.memory_space<vmem>>, vector<16x64xbf16>
    %c0_13 = arith.constant 0 : index
    %c0_14 = arith.constant 0 : index
    %c0_15 = arith.constant 0 : index
    %10 = vector.load %arg2[%c0_13, %c0_14, %c0_15] : memref<3x64x128xbf16, #tpu.memory_space<vmem>>, vector<1x64x128xbf16>
    %11 = vector.shape_cast %10 : vector<1x64x128xbf16> to vector<64x128xbf16>
    %cst_16 = arith.constant dense<0.000000e+00> : vector<16x128xf32>
    %12 = tpu.matmul %9, %11, %cst_16 {dimension_numbers = #tpu.dot_dimension_numbers<[1], [0], [0], [1], [0, 0, 1, 1], [], []>} : vector<16x64xbf16>, vector<64x128xbf16>, vector<16x128xf32> -> vector<16x128xf32>
    %c1_17 = arith.constant 1 : index
    %c0_18 = arith.constant 0 : index
    %13 = vector.load %arg8[%c1_17, %c0_18] : memref<18x64xbf16, #tpu.memory_space<vmem>>, vector<16x64xbf16>
    %c1_19 = arith.constant 1 : index
    %c0_20 = arith.constant 0 : index
    %c0_21 = arith.constant 0 : index
    %14 = vector.load %arg2[%c1_19, %c0_20, %c0_21] : memref<3x64x128xbf16, #tpu.memory_space<vmem>>, vector<1x64x128xbf16>
    %15 = vector.shape_cast %14 : vector<1x64x128xbf16> to vector<64x128xbf16>
    %cst_22 = arith.constant dense<0.000000e+00> : vector<16x128xf32>
    %16 = tpu.matmul %13, %15, %cst_22 {dimension_numbers = #tpu.dot_dimension_numbers<[1], [0], [0], [1], [0, 0, 1, 1], [], []>} : vector<16x64xbf16>, vector<64x128xbf16>, vector<16x128xf32> -> vector<16x128xf32>
    %17 = arith.addf %12, %16 : vector<16x128xf32>
    %c2 = arith.constant 2 : index
    %c0_23 = arith.constant 0 : index
    %18 = vector.load %arg8[%c2, %c0_23] : memref<18x64xbf16, #tpu.memory_space<vmem>>, vector<16x64xbf16>
    %c2_24 = arith.constant 2 : index
    %c0_25 = arith.constant 0 : index
    %c0_26 = arith.constant 0 : index
    %19 = vector.load %arg2[%c2_24, %c0_25, %c0_26] : memref<3x64x128xbf16, #tpu.memory_space<vmem>>, vector<1x64x128xbf16>
    %20 = vector.shape_cast %19 : vector<1x64x128xbf16> to vector<64x128xbf16>
    %cst_27 = arith.constant dense<0.000000e+00> : vector<16x128xf32>
    %21 = tpu.matmul %18, %20, %cst_27 {dimension_numbers = #tpu.dot_dimension_numbers<[1], [0], [0], [1], [0, 0, 1, 1], [], []>} : vector<16x64xbf16>, vector<64x128xbf16>, vector<16x128xf32> -> vector<16x128xf32>
    %22 = arith.addf %17, %21 : vector<16x128xf32>
    %cst_28 = arith.constant dense<0.000000e+00> : vector<128xf32>
    %23 = vector.multi_reduction <add>, %22, %cst_28 [0] : vector<16x128xf32> to vector<128xf32>
    %24 = vector.shape_cast %23 : vector<128xf32> to vector<1x128xf32>
    %cst_29 = arith.constant dense<0.000000e+00> : vector<1x8xf32>
    %25 = tpu.matmul %24, %0, %cst_29 {dimension_numbers = #tpu.dot_dimension_numbers<[1], [0], [0], [1], [0, 0, 1, 1], [], []>} : vector<1x128xf32>, vector<128x8xf32>, vector<1x8xf32> -> vector<1x8xf32>
    %26 = arith.mulf %22, %22 : vector<16x128xf32>
    %cst_30 = arith.constant dense<0.000000e+00> : vector<128xf32>
    %27 = vector.multi_reduction <add>, %26, %cst_30 [0] : vector<16x128xf32> to vector<128xf32>
    %28 = vector.shape_cast %27 : vector<128xf32> to vector<1x128xf32>
    %cst_31 = arith.constant dense<0.000000e+00> : vector<1x8xf32>
    %29 = tpu.matmul %28, %0, %cst_31 {dimension_numbers = #tpu.dot_dimension_numbers<[1], [0], [0], [1], [0, 0, 1, 1], [], []>} : vector<1x128xf32>, vector<128x8xf32>, vector<1x8xf32> -> vector<1x8xf32>
    %cst_32 = arith.constant 3.906250e-03 : f32
    %30 = vector.broadcast %cst_32 : f32 to vector<1x8xf32>
    %31 = arith.mulf %25, %30 : vector<1x8xf32>
    %cst_33 = arith.constant 3.906250e-03 : f32
    %32 = vector.broadcast %cst_33 : f32 to vector<1x8xf32>
    %33 = arith.mulf %29, %32 : vector<1x8xf32>
    %34 = arith.mulf %31, %31 : vector<1x8xf32>
    %35 = arith.subf %33, %34 : vector<1x8xf32>
    %cst_34 = arith.constant 0.000000e+00 : f32
    %36 = vector.broadcast %cst_34 : f32 to vector<1x8xf32>
    %37 = arith.maximumf %35, %36 : vector<1x8xf32>
    %cst_35 = arith.constant 9.99999974E-6 : f32
    %38 = vector.broadcast %cst_35 : f32 to vector<1x8xf32>
    %39 = arith.addf %37, %38 : vector<1x8xf32>
    %40 = math.rsqrt %39 : vector<1x8xf32>
    %cst_36 = arith.constant dense<0.000000e+00> : vector<1x128xf32>
    %41 = tpu.matmul %31, %1, %cst_36 {dimension_numbers = #tpu.dot_dimension_numbers<[1], [0], [0], [1], [0, 0, 1, 1], [], []>} : vector<1x8xf32>, vector<8x128xf32>, vector<1x128xf32> -> vector<1x128xf32>
    %cst_37 = arith.constant dense<0.000000e+00> : vector<1x128xf32>
    %42 = tpu.matmul %40, %1, %cst_37 {dimension_numbers = #tpu.dot_dimension_numbers<[1], [0], [0], [1], [0, 0, 1, 1], [], []>} : vector<1x8xf32>, vector<8x128xf32>, vector<1x128xf32> -> vector<1x128xf32>
    %43 = vector.broadcast %41 : vector<1x128xf32> to vector<16x128xf32>
    %44 = arith.subf %22, %43 : vector<16x128xf32>
    %45 = vector.broadcast %42 : vector<1x128xf32> to vector<16x128xf32>
    %46 = arith.mulf %44, %45 : vector<16x128xf32>
    %cst_38 = arith.constant 0.000000e+00 : bf16
    %47 = vector.broadcast %cst_38 : bf16 to vector<1x128xbf16>
    %c0_39 = arith.constant 0 : index
    %c0_40 = arith.constant 0 : index
    %48 = vector.load %arg9[%c0_39, %c0_40] : memref<18x128xbf16, #tpu.memory_space<vmem>>, vector<1x128xbf16>
    tpu.vector_store %arg9[%c0_39, %c0_40], %47 {strides = array<i32>} : memref<18x128xbf16, #tpu.memory_space<vmem>>, vector<1x128xbf16>,
    %cst_41 = arith.constant 0.000000e+00 : bf16
    %49 = vector.broadcast %cst_41 : bf16 to vector<1x128xbf16>
    %c17_42 = arith.constant 17 : index
    %c0_43 = arith.constant 0 : index
    %50 = vector.load %arg9[%c17_42, %c0_43] : memref<18x128xbf16, #tpu.memory_space<vmem>>, vector<1x128xbf16>
    tpu.vector_store %arg9[%c17_42, %c0_43], %49 {strides = array<i32>} : memref<18x128xbf16, #tpu.memory_space<vmem>>, vector<1x128xbf16>,
    %51 = arith.truncf %46 : vector<16x128xf32> to vector<16x128xbf16>
    %c1_44 = arith.constant 1 : index
    %c0_45 = arith.constant 0 : index
    %52 = vector.load %arg9[%c1_44, %c0_45] : memref<18x128xbf16, #tpu.memory_space<vmem>>, vector<16x128xbf16>
    tpu.vector_store %arg9[%c1_44, %c0_45], %51 {strides = array<i32>} : memref<18x128xbf16, #tpu.memory_space<vmem>>, vector<16x128xbf16>,
    %c0_46 = arith.constant 0 : index
    %c0_47 = arith.constant 0 : index
    %53 = vector.load %arg9[%c0_46, %c0_47] : memref<18x128xbf16, #tpu.memory_space<vmem>>, vector<16x128xbf16>
    %c0_48 = arith.constant 0 : index
    %c0_49 = arith.constant 0 : index
    %c0_50 = arith.constant 0 : index
    %54 = vector.load %arg3[%c0_48, %c0_49, %c0_50] : memref<3x128x128xbf16, #tpu.memory_space<vmem>>, vector<1x128x128xbf16>
    %55 = vector.shape_cast %54 : vector<1x128x128xbf16> to vector<128x128xbf16>
    %cst_51 = arith.constant dense<0.000000e+00> : vector<16x128xf32>
    %56 = tpu.matmul %53, %55, %cst_51 {dimension_numbers = #tpu.dot_dimension_numbers<[1], [0], [0], [1], [0, 0, 1, 1], [], []>} : vector<16x128xbf16>, vector<128x128xbf16>, vector<16x128xf32> -> vector<16x128xf32>
    %c1_52 = arith.constant 1 : index
    %c0_53 = arith.constant 0 : index
    %57 = vector.load %arg9[%c1_52, %c0_53] : memref<18x128xbf16, #tpu.memory_space<vmem>>, vector<16x128xbf16>
    %c1_54 = arith.constant 1 : index
    %c0_55 = arith.constant 0 : index
    %c0_56 = arith.constant 0 : index
    %58 = vector.load %arg3[%c1_54, %c0_55, %c0_56] : memref<3x128x128xbf16, #tpu.memory_space<vmem>>, vector<1x128x128xbf16>
    %59 = vector.shape_cast %58 : vector<1x128x128xbf16> to vector<128x128xbf16>
    %cst_57 = arith.constant dense<0.000000e+00> : vector<16x128xf32>
    %60 = tpu.matmul %57, %59, %cst_57 {dimension_numbers = #tpu.dot_dimension_numbers<[1], [0], [0], [1], [0, 0, 1, 1], [], []>} : vector<16x128xbf16>, vector<128x128xbf16>, vector<16x128xf32> -> vector<16x128xf32>
    %61 = arith.addf %56, %60 : vector<16x128xf32>
    %c2_58 = arith.constant 2 : index
    %c0_59 = arith.constant 0 : index
    %62 = vector.load %arg9[%c2_58, %c0_59] : memref<18x128xbf16, #tpu.memory_space<vmem>>, vector<16x128xbf16>
    %c2_60 = arith.constant 2 : index
    %c0_61 = arith.constant 0 : index
    %c0_62 = arith.constant 0 : index
    %63 = vector.load %arg3[%c2_60, %c0_61, %c0_62] : memref<3x128x128xbf16, #tpu.memory_space<vmem>>, vector<1x128x128xbf16>
    %64 = vector.shape_cast %63 : vector<1x128x128xbf16> to vector<128x128xbf16>
    %cst_63 = arith.constant dense<0.000000e+00> : vector<16x128xf32>
    %65 = tpu.matmul %62, %64, %cst_63 {dimension_numbers = #tpu.dot_dimension_numbers<[1], [0], [0], [1], [0, 0, 1, 1], [], []>} : vector<16x128xbf16>, vector<128x128xbf16>, vector<16x128xf32> -> vector<16x128xf32>
    %66 = arith.addf %61, %65 : vector<16x128xf32>
    %cst_64 = arith.constant dense<0.000000e+00> : vector<128xf32>
    %67 = vector.multi_reduction <add>, %66, %cst_64 [0] : vector<16x128xf32> to vector<128xf32>
    %68 = vector.shape_cast %67 : vector<128xf32> to vector<1x128xf32>
    %cst_65 = arith.constant dense<0.000000e+00> : vector<1x8xf32>
    %69 = tpu.matmul %68, %0, %cst_65 {dimension_numbers = #tpu.dot_dimension_numbers<[1], [0], [0], [1], [0, 0, 1, 1], [], []>} : vector<1x128xf32>, vector<128x8xf32>, vector<1x8xf32> -> vector<1x8xf32>
    %70 = arith.mulf %66, %66 : vector<16x128xf32>
    %cst_66 = arith.constant dense<0.000000e+00> : vector<128xf32>
    %71 = vector.multi_reduction <add>, %70, %cst_66 [0] : vector<16x128xf32> to vector<128xf32>
    %72 = vector.shape_cast %71 : vector<128xf32> to vector<1x128xf32>
    %cst_67 = arith.constant dense<0.000000e+00> : vector<1x8xf32>
    %73 = tpu.matmul %72, %0, %cst_67 {dimension_numbers = #tpu.dot_dimension_numbers<[1], [0], [0], [1], [0, 0, 1, 1], [], []>} : vector<1x128xf32>, vector<128x8xf32>, vector<1x8xf32> -> vector<1x8xf32>
    %cst_68 = arith.constant 3.906250e-03 : f32
    %74 = vector.broadcast %cst_68 : f32 to vector<1x8xf32>
    %75 = arith.mulf %69, %74 : vector<1x8xf32>
    %cst_69 = arith.constant 3.906250e-03 : f32
    %76 = vector.broadcast %cst_69 : f32 to vector<1x8xf32>
    %77 = arith.mulf %73, %76 : vector<1x8xf32>
    %78 = arith.mulf %75, %75 : vector<1x8xf32>
    %79 = arith.subf %77, %78 : vector<1x8xf32>
    %cst_70 = arith.constant 0.000000e+00 : f32
    %80 = vector.broadcast %cst_70 : f32 to vector<1x8xf32>
    %81 = arith.maximumf %79, %80 : vector<1x8xf32>
    %cst_71 = arith.constant 9.99999974E-6 : f32
    %82 = vector.broadcast %cst_71 : f32 to vector<1x8xf32>
    %83 = arith.addf %81, %82 : vector<1x8xf32>
    %84 = math.rsqrt %83 : vector<1x8xf32>
    %cst_72 = arith.constant dense<0.000000e+00> : vector<1x128xf32>
    %85 = tpu.matmul %75, %1, %cst_72 {dimension_numbers = #tpu.dot_dimension_numbers<[1], [0], [0], [1], [0, 0, 1, 1], [], []>} : vector<1x8xf32>, vector<8x128xf32>, vector<1x128xf32> -> vector<1x128xf32>
    %cst_73 = arith.constant dense<0.000000e+00> : vector<1x128xf32>
    %86 = tpu.matmul %84, %1, %cst_73 {dimension_numbers = #tpu.dot_dimension_numbers<[1], [0], [0], [1], [0, 0, 1, 1], [], []>} : vector<1x8xf32>, vector<8x128xf32>, vector<1x128xf32> -> vector<1x128xf32>
    %87 = vector.broadcast %85 : vector<1x128xf32> to vector<16x128xf32>
    %88 = arith.subf %66, %87 : vector<16x128xf32>
    %89 = vector.broadcast %86 : vector<1x128xf32> to vector<16x128xf32>
    %90 = arith.mulf %88, %89 : vector<16x128xf32>
    %c0_74 = arith.constant 0 : index
    %c0_75 = arith.constant 0 : index
    %91 = vector.load %arg8[%c0_74, %c0_75] : memref<18x64xbf16, #tpu.memory_space<vmem>>, vector<16x64xbf16>
    %c0_76 = arith.constant 0 : index
    %c0_77 = arith.constant 0 : index
    %c0_78 = arith.constant 0 : index
    %92 = vector.load %arg4[%c0_76, %c0_77, %c0_78] : memref<3x64x128xbf16, #tpu.memory_space<vmem>>, vector<1x64x128xbf16>
    %93 = vector.shape_cast %92 : vector<1x64x128xbf16> to vector<64x128xbf16>
    %cst_79 = arith.constant dense<0.000000e+00> : vector<16x128xf32>
    %94 = tpu.matmul %91, %93, %cst_79 {dimension_numbers = #tpu.dot_dimension_numbers<[1], [0], [0], [1], [0, 0, 1, 1], [], []>} : vector<16x64xbf16>, vector<64x128xbf16>, vector<16x128xf32> -> vector<16x128xf32>
    %c1_80 = arith.constant 1 : index
    %c0_81 = arith.constant 0 : index
    %95 = vector.load %arg8[%c1_80, %c0_81] : memref<18x64xbf16, #tpu.memory_space<vmem>>, vector<16x64xbf16>
    %c1_82 = arith.constant 1 : index
    %c0_83 = arith.constant 0 : index
    %c0_84 = arith.constant 0 : index
    %96 = vector.load %arg4[%c1_82, %c0_83, %c0_84] : memref<3x64x128xbf16, #tpu.memory_space<vmem>>, vector<1x64x128xbf16>
    %97 = vector.shape_cast %96 : vector<1x64x128xbf16> to vector<64x128xbf16>
    %cst_85 = arith.constant dense<0.000000e+00> : vector<16x128xf32>
    %98 = tpu.matmul %95, %97, %cst_85 {dimension_numbers = #tpu.dot_dimension_numbers<[1], [0], [0], [1], [0, 0, 1, 1], [], []>} : vector<16x64xbf16>, vector<64x128xbf16>, vector<16x128xf32> -> vector<16x128xf32>
    %99 = arith.addf %94, %98 : vector<16x128xf32>
    %c2_86 = arith.constant 2 : index
    %c0_87 = arith.constant 0 : index
    %100 = vector.load %arg8[%c2_86, %c0_87] : memref<18x64xbf16, #tpu.memory_space<vmem>>, vector<16x64xbf16>
    %c2_88 = arith.constant 2 : index
    %c0_89 = arith.constant 0 : index
    %c0_90 = arith.constant 0 : index
    %101 = vector.load %arg4[%c2_88, %c0_89, %c0_90] : memref<3x64x128xbf16, #tpu.memory_space<vmem>>, vector<1x64x128xbf16>
    %102 = vector.shape_cast %101 : vector<1x64x128xbf16> to vector<64x128xbf16>
    %cst_91 = arith.constant dense<0.000000e+00> : vector<16x128xf32>
    %103 = tpu.matmul %100, %102, %cst_91 {dimension_numbers = #tpu.dot_dimension_numbers<[1], [0], [0], [1], [0, 0, 1, 1], [], []>} : vector<16x64xbf16>, vector<64x128xbf16>, vector<16x128xf32> -> vector<16x128xf32>
    %104 = arith.addf %99, %103 : vector<16x128xf32>
    %cst_92 = arith.constant dense<0.000000e+00> : vector<128xf32>
    %105 = vector.multi_reduction <add>, %104, %cst_92 [0] : vector<16x128xf32> to vector<128xf32>
    %106 = vector.shape_cast %105 : vector<128xf32> to vector<1x128xf32>
    %cst_93 = arith.constant dense<0.000000e+00> : vector<1x8xf32>
    %107 = tpu.matmul %106, %0, %cst_93 {dimension_numbers = #tpu.dot_dimension_numbers<[1], [0], [0], [1], [0, 0, 1, 1], [], []>} : vector<1x128xf32>, vector<128x8xf32>, vector<1x8xf32> -> vector<1x8xf32>
    %108 = arith.mulf %104, %104 : vector<16x128xf32>
    %cst_94 = arith.constant dense<0.000000e+00> : vector<128xf32>
    %109 = vector.multi_reduction <add>, %108, %cst_94 [0] : vector<16x128xf32> to vector<128xf32>
    %110 = vector.shape_cast %109 : vector<128xf32> to vector<1x128xf32>
    %cst_95 = arith.constant dense<0.000000e+00> : vector<1x8xf32>
    %111 = tpu.matmul %110, %0, %cst_95 {dimension_numbers = #tpu.dot_dimension_numbers<[1], [0], [0], [1], [0, 0, 1, 1], [], []>} : vector<1x128xf32>, vector<128x8xf32>, vector<1x8xf32> -> vector<1x8xf32>
    %cst_96 = arith.constant 3.906250e-03 : f32
    %112 = vector.broadcast %cst_96 : f32 to vector<1x8xf32>
    %113 = arith.mulf %107, %112 : vector<1x8xf32>
    %cst_97 = arith.constant 3.906250e-03 : f32
    %114 = vector.broadcast %cst_97 : f32 to vector<1x8xf32>
    %115 = arith.mulf %111, %114 : vector<1x8xf32>
    %116 = arith.mulf %113, %113 : vector<1x8xf32>
    %117 = arith.subf %115, %116 : vector<1x8xf32>
    %cst_98 = arith.constant 0.000000e+00 : f32
    %118 = vector.broadcast %cst_98 : f32 to vector<1x8xf32>
    %119 = arith.maximumf %117, %118 : vector<1x8xf32>
    %cst_99 = arith.constant 9.99999974E-6 : f32
    %120 = vector.broadcast %cst_99 : f32 to vector<1x8xf32>
    %121 = arith.addf %119, %120 : vector<1x8xf32>
    %122 = math.rsqrt %121 : vector<1x8xf32>
    %cst_100 = arith.constant dense<0.000000e+00> : vector<1x128xf32>
    %123 = tpu.matmul %113, %1, %cst_100 {dimension_numbers = #tpu.dot_dimension_numbers<[1], [0], [0], [1], [0, 0, 1, 1], [], []>} : vector<1x8xf32>, vector<8x128xf32>, vector<1x128xf32> -> vector<1x128xf32>
    %cst_101 = arith.constant dense<0.000000e+00> : vector<1x128xf32>
    %124 = tpu.matmul %122, %1, %cst_101 {dimension_numbers = #tpu.dot_dimension_numbers<[1], [0], [0], [1], [0, 0, 1, 1], [], []>} : vector<1x8xf32>, vector<8x128xf32>, vector<1x128xf32> -> vector<1x128xf32>
    %125 = vector.broadcast %123 : vector<1x128xf32> to vector<16x128xf32>
    %126 = arith.subf %104, %125 : vector<16x128xf32>
    %127 = vector.broadcast %124 : vector<1x128xf32> to vector<16x128xf32>
    %128 = arith.mulf %126, %127 : vector<16x128xf32>
    %129 = arith.addf %90, %128 : vector<16x128xf32>
    %c0_102 = arith.constant 0 : index
    %c0_103 = arith.constant 0 : index
    %c0_104 = arith.constant 0 : index
    %130 = vector.load %arg7[%c0_102, %c0_103, %c0_104] : memref<1x16x128xf32, #tpu.memory_space<vmem>>, vector<1x16x128xf32>
    %131 = vector.shape_cast %130 : vector<1x16x128xf32> to vector<16x128xf32>
    %132 = vector.shape_cast %129 : vector<16x128xf32> to vector<1x16x128xf32>
    tpu.vector_store %arg7[%c0_102, %c0_103, %c0_104], %132 {strides = array<i32>} : memref<1x16x128xf32, #tpu.memory_space<vmem>>, vector<1x16x128xf32>,
    return
  }
  func.func @transform_0(%arg0: i32) -> (i32, i32, i32) {
    %c0_i32 = arith.constant 0 : i32
    %c0_i32_0 = arith.constant 0 : i32
    %c0_i32_1 = arith.constant 0 : i32
    return %arg0, %c0_i32, %c0_i32_0 : i32, i32, i32
  }
  func.func @transform_1(%arg0: i32) -> (i32, i32, i32) {
    %c0_i32 = arith.constant 0 : i32
    %c0_i32_0 = arith.constant 0 : i32
    %c0_i32_1 = arith.constant 0 : i32
    %c0_i32_2 = arith.constant 0 : i32
    return %c0_i32, %c0_i32_0, %c0_i32_1 : i32, i32, i32
  }
  func.func @transform_2(%arg0: i32) -> (i32, i32, i32) {
    %c0_i32 = arith.constant 0 : i32
    %c0_i32_0 = arith.constant 0 : i32
    %c0_i32_1 = arith.constant 0 : i32
    %c0_i32_2 = arith.constant 0 : i32
    return %c0_i32, %c0_i32_0, %c0_i32_1 : i32, i32, i32
  }
  func.func @transform_3(%arg0: i32) -> (i32, i32, i32) {
    %c0_i32 = arith.constant 0 : i32
    %c0_i32_0 = arith.constant 0 : i32
    %c0_i32_1 = arith.constant 0 : i32
    %c0_i32_2 = arith.constant 0 : i32
    return %c0_i32, %c0_i32_0, %c0_i32_1 : i32, i32, i32
  }
  func.func @transform_4(%arg0: i32) -> (i32, i32) {
    %c0_i32 = arith.constant 0 : i32
    %c0_i32_0 = arith.constant 0 : i32
    %c0_i32_1 = arith.constant 0 : i32
    return %c0_i32, %c0_i32_0 : i32, i32
  }
  func.func @transform_5(%arg0: i32) -> (i32, i32) {
    %c0_i32 = arith.constant 0 : i32
    %c0_i32_0 = arith.constant 0 : i32
    %c0_i32_1 = arith.constant 0 : i32
    return %c0_i32, %c0_i32_0 : i32, i32
  }
  func.func @transform_6(%arg0: i32) -> (i32, i32, i32) {
    %c0_i32 = arith.constant 0 : i32
    %c0_i32_0 = arith.constant 0 : i32
    %c0_i32_1 = arith.constant 0 : i32
    return %arg0, %c0_i32, %c0_i32_0 : i32, i32, i32
  }
}

</mosaic_0001>

<bundles_post_ra>
// kernel: resblock_forward.1
= control target key start
LH: loop header
LB: loop body
LE: loop exit
PB: predicated region body
PF: predicated region fallthrough
CT: control target
= control target key end

     0   :  { %s3240_s21 = smov 0   ;;  %s3762_s0 = inlined_call_operand.vmem [shape: bf16[2,16,64], index: 0, kind: input, shape index: {}]   ;;  %s3763_s1 = inlined_call_operand.vmem [shape: bf16[3,64,128], index: 1, kind: input, shape index: {}]   ;;  %s3764_s2 = inlined_call_operand.vmem [shape: bf16[3,128,128], index: 2, kind: input, shape index: {}]   ;;  %s3765_s3 = inlined_call_operand.vmem [shape: bf16[3,64,128], index: 3, kind: input, shape index: {}]   ;;  %s3766_s4 = inlined_call_operand.vmem [shape: f32[128,8], index: 4, kind: input, shape index: {}]   ;;  %s3767_s5 = inlined_call_operand.vmem [shape: f32[8,128], index: 5, kind: input, shape index: {}]   ;;  %s3768_s6 = inlined_call_operand.vmem [shape: f32[2,16,128], index: 6, kind: output, shape index: {}]  }
   0x1 LB: > { %s2259_s22 = sadd.s32 4294967295, %s3200_s21   ;;  %p2263_p0 = scmp.ge.s32.totalorder %s3200_s21, 1  ;;  %s3200_s21 = sphi %s3240_s21, %s16_s21  }
   0x2   : > { %p212_p1 = scmp.lt.s32.totalorder %s3200_s21, 3 }
   0x4   : > { %p213_p2 = pnand %p2263_p0, %p212_p1 }
   0x5   : > { %v3131_v0 = vld [vmem:[%s3763_s1 + $0x20] sm:$0xff] (!%p213_p2)   ;;  %v3202_v1 = vmov (!%p213_p2), 0.0   ;;  %v3132_v2 = vld [vmem:[%s3763_s1 + $0x28] sm:$0xff] (!%p213_p2)   ;;  %vm3203_vm0 = vmmov (!%p213_p2), 0   ;;  %p242_p3 = scmp.lt.s32.totalorder (!%p213_p2), %s2259_s22, 1  ;;  %vm270_vm1 = vcmask (!%p213_p2), 516096  }
   0x6   : > { %216 = sbr.rel (%p213_p2) target bundleno = 1858 (0x742), region = 44  ;;  %2580 = vmatprep.subr.bf16.mxu0 (!%p213_p2), %v3202_v1  ;;  %2588 = vmatprep.mubr.msk.bf16.mxu0 (!%p213_p2), %vm3203_vm0, %v3202_v1  ;;  %vm271_vm2 = vsmask.f32 (!%p213_p2), 256  ;;  %v273_v3 = vld [vmem:[#allocation2] sm:$0x1] (!%p213_p2)  ;;  %v3133_v6 = vld [vmem:[%s3763_s1 + $0x30] sm:$0xff] (!%p213_p2)  }
   0x7   : > { %2581 = vmatpush3.bf16.msra.mxu0 (!%p213_p2), %v3131_v0  ;;  %2648 = vmatprep.mubr.msk.f32.mxu1 (!%p213_p2), %vm3203_vm0, %v3202_v1  ;;  %vm3263_vm3 = vmand (!%p213_p2), %vm270_vm1, %vm271_vm2  ;;  %vm276_vm4 = vsmask.f32 (!%p213_p2), 7938  ;;  %v278_v5 = vld [vmem:[#allocation2 + $0x8] sm:$0x1] (!%p213_p2)  ;;  %vm283_vm6 = vsmask.f32 (!%p213_p2), 4368 }
   0x8   : > { %2582 = vmatprep.subr.bf16.mxu0 (!%p213_p2), %v3202_v1  ;;  %v274_v7 = vsel (!%p213_p2), %vm3263_vm3, 0, %v273_v3  ;;  %vm277_vm5 = vmand (!%p213_p2), %vm270_vm1, %vm276_vm4  ;;  %v3134_v9 = vld [vmem:[%s3763_s1 + $0x38] sm:$0xff] (!%p213_p2)   ;;  %vm305_vm7 = vcmask (!%p213_p2), 519168   ;;  %v3204_v16 = vmov (!%p213_p2), 0.0|0.0   ;;  %v253_v29 = vld [vmem:[%s3766_s4] sm:$0xff] (!%p213_p2)  ;;  %vm380_vm11 = vcmask (!%p213_p2), 523264  }
   0x9   : > { %275 = vst [vmem:[#allocation2] sm:$0x1] (!%p213_p2), %v274_v7  ;;  %v279_v8 = vsel (!%p213_p2), %vm277_vm5, 0, %v278_v5  ;;  %2952 = vmatprep.subr.bf16.mxu1 (!%p213_p2), %v3204_v16  ;;  %vm3284_vm8 = vmor (!%p213_p2), %vm271_vm2, %vm283_vm6  ;;  %v254_v30 = vld [vmem:[%s3766_s4 + $0x8] sm:$0xff] (!%p213_p2)  ;;  %v255_v32 = vld [vmem:[%s3766_s4 + $0x10] sm:$0xff] (!%p213_p2)  ;;  %vm505_vm12 = vcmask (!%p213_p2), 1046528  }
   0xa   : > { %280 = vst [vmem:[#allocation2 + $0x8] sm:$0x1] (!%p213_p2), %v279_v8  ;;  %vm306_vm9 = vmand (!%p213_p2), %vm305_vm7, %vm276_vm4  ;;  %v3303_v31 = vpack.c.bf16 (!%p213_p2), %v254_v30, %v253_v29  ;;  %v256_v33 = vld [vmem:[%s3766_s4 + $0x18] sm:$0xff] (!%p213_p2)  ;;  %v257_v34 = vld [vmem:[%s3766_s4 + $0x20] sm:$0xff] (!%p213_p2)  ;;  %vm343_vm10 = vsmask.f32 (!%p213_p2), 7424 }
   0xb   : > { %2583 = vmatpush3.bf16.msra.mxu0 (!%p213_p2), %v3132_v2  ;;  %v258_v35 = vld [vmem:[%s3766_s4 + $0x28] sm:$0xff] (!%p213_p2)  ;;  %v3318_v36 = vpack.c.bf16 (!%p213_p2), %v256_v33, %v255_v32  ;;  %v259_v39 = vld [vmem:[%s3766_s4 + $0x30] sm:$0xff] (!%p213_p2)  ;;  %v260_v43 = vld [vmem:[%s3766_s4 + $0x38] sm:$0xff] (!%p213_p2)  ;;  %vm742_vm13 = vcmask (!%p213_p2), 64512   ;;  %vm901_vm14 = vcmask (!%p213_p2), 1040384  }
   0xc   : > { %2584 = vmatprep.subr.bf16.mxu0 (!%p213_p2), %v3202_v1  ;;  %2954 = vmatpush3.bf16.msra.mxu1 (!%p213_p2), %v3303_v31  ;;  %v3325_v42 = vpack.c.bf16 (!%p213_p2), %v258_v35, %v257_v34  ;;  %v3137_v49 = vld [vmem:[%s3763_s1] sm:$0xff] (!%p213_p2)   ;;  %v3335_v50 = vpack.c.bf16 (!%p213_p2), %v260_v43, %v259_v39  ;;  %v3138_v53 = vld [vmem:[%s3763_s1 + $0x8] sm:$0xff] (!%p213_p2)   ;;  %v3139_v54 = vld [vmem:[%s3763_s1 + $0x10] sm:$0xff] (!%p213_p2)  }
   0xd   : > { %s3776_s22 = smov (!%p242_p3, %s2259_s22), 1  ;;  %2955 = vmatprep.subr.bf16.mxu1 %v3204_v16  ;;  %v3140_v55 = vld [vmem:[%s3763_s1 + $0x18] sm:$0xff]   ;;  %v3141_v56 = vld [vmem:[%s3763_s1 + $0x40] sm:$0xff]   ;;  %v3142_v57 = vld [vmem:[%s3763_s1 + $0x48] sm:$0xff]  }
   0xe   : > { %s2405_s29 = sshll.u32 %s3776_s22, 3  ;;  %v3143_v59 = vld [vmem:[%s3763_s1 + $0x50] sm:$0xff]   ;;  %v3144_v61 = vld [vmem:[%s3763_s1 + $0x58] sm:$0xff]   ;;  %v261_v2 = vld [vmem:[%s3766_s4 + $0x40] sm:$0xff]  ;;  %s2406_s25 = sshll.u32 %s3776_s22, 4 }
   0xf   : > { %s246_s8 = scalar_lea.vmem %s3762_s0, %s2405_s29  ;;  %2585 = vmatpush3.bf16.msra.mxu0 %v3133_v6  ;;  %v262_v3 = vld [vmem:[%s3766_s4 + $0x48] sm:$0xff]  ;;  %v263_v5 = vld [vmem:[%s3766_s4 + $0x50] sm:$0xff]  ;;  %v264_v6 = vld [vmem:[%s3766_s4 + $0x58] sm:$0xff]  ;;  %s251_s28 = scalar_lea.vmem %s3768_s6, %s2406_s25 }
  0x10   : > { %v281_v10 = vld [vmem:[%s246_s8] sm:$0xf]  ;;  %v282_v11 = vld [vmem:[%s246_s8 + $0x4] sm:$0xf]  ;;  %2586 = vmatprep.subr.bf16.mxu0 %v3202_v1  ;;  %2957 = vmatpush3.bf16.msra.mxu1 %v3318_v36  ;;  %v3386_v4 = vpack.c.bf16 %v262_v3, %v261_v2  ;;  %v3396_v7 = vpack.c.bf16 %v264_v6, %v263_v5  ;;  %vm3489_vm15 = vmand %vm901_vm14, %vm271_vm2  ;;  %v889_v2 = vlaneseq  ;;  %vm936_vm2 = vcmask 1043456  }
  0x11   : > { %v286_v12 = vshrl.u32 %v281_v10, 16  ;;  %v289_v13 = vshll.u32 %v281_v10, 16  ;;  %v294_v14 = vshrl.u32 %v282_v11, 16  ;;  %v297_v15 = vshll.u32 %v282_v11, 16  ;;  %v307_v24 = vld [vmem:[#allocation2] sm:$0xf]  ;;  %2958 = vmatprep.subr.bf16.mxu1 %v3204_v16  ;;  %vm906_vm1 = vmand %vm901_vm14, %vm276_vm4 }
  0x12   : > { %v312_v27 = vld [vmem:[#allocation2 + $0x8] sm:$0x1]  ;;  %v265_v8 = vld [vmem:[%s3766_s4 + $0x60] sm:$0xff]  ;;  %v267_v11 = vld [vmem:[%s3766_s4 + $0x70] sm:$0xff]  ;;  %v890_v3 = vshrl.u32 %v889_v2, 7 }
  0x13   : > { %v288_v18 = vrot.slane %v286_v12, 7  ;;  %v296_v19 = vrot.slane %v294_v14, 7  ;;  %2587 = vmatpush3.bf16.msra.mxu0 %v3134_v9  ;;  %v266_v9 = vld [vmem:[%s3766_s4 + $0x68] sm:$0xff]  ;;  %v268_v12 = vld [vmem:[%s3766_s4 + $0x78] sm:$0xff] }
  0x14   : > { %2592 = vmatprep.subr.bf16.mxu0 %v3202_v1  ;;  %2960 = vmatpush3.bf16.msra.mxu1 %v3325_v42  ;;  %v3406_v10 = vpack.c.bf16 %v266_v9, %v265_v8  ;;  %v3521_v5 = vsub.s32 0, %v890_v3  ;;  %v3163_v2 = vld [vmem:[%s3764_s2 + $0x38] sm:$0xff]   ;;  %v3164_v3 = vld [vmem:[%s3764_s2 + $0x80] sm:$0xff]  }
  0x15   : > { %v291_v20 = vor.u32 %v289_v13, %v288_v18  ;;  %v292_v21 = vrot.slane %v288_v18, 4  ;;  %v299_v22 = vor.u32 %v297_v15, %v296_v19  ;;  %v301_v23 = vrot.slane %v296_v19, 4  ;;  %2961 = vmatprep.subr.bf16.mxu1 %v3204_v16 }
  0x16   : > { %v3416_v13 = vpack.c.bf16 %v268_v12, %v267_v11 }
  0x17   : > { %v300_v25 = vsel %vm3284_vm8, %v292_v21, %v299_v22  ;;  %v308_v26 = vsel %vm306_vm9, %v291_v20, %v307_v24  ;;  %v313_v28 = vsel %vm3263_vm3, %v301_v23, %v312_v27  ;;  %vm937_vm3 = vmand %vm936_vm2, %vm276_vm4 }
  0x18   : > { %309 = vst [vmem:[#allocation2] sm:$0xf] %v308_v26  ;;  %311 = vst.msk [vmem:[#allocation2 + $0x4] sm:$0xf] %vm305_vm7, %v300_v25  ;;  %2963 = vmatpush3.bf16.msra.mxu1 %v3335_v50 }
  0x19   : > { %314 = vst [vmem:[#allocation2 + $0x8] sm:$0x1] %v313_v28  ;;  %2964 = vmatprep.subr.bf16.mxu1 %v3204_v16 }
  0x1c   : > { %2966 = vmatpush3.bf16.msra.mxu1 %v3386_v4 }
  0x1d   : > { %2967 = vmatprep.subr.bf16.mxu1 %v3204_v16 }
  0x1f   : > { %v315_v37 = vld [vmem:[#allocation2] sm:$0xf]  ;;  %v316_v38 = vld [vmem:[#allocation2 + $0x4] sm:$0xf] }
  0x20   : > { %v2276_v40 = vcombine.low %v315_v37, %v316_v38  ;;  %v3136_v41 = vld [vmem:[#allocation2 + $0x8] ss:$0 sps:$4 sm:$0x11]   ;;  %v492_v58 = vld [vmem:[#allocation2] sm:$0xe]  ;;  %2969 = vmatpush3.bf16.msra.mxu1 %v3396_v7 }
  0x21   : > { %v352_v46 = vshll.u32 %v3136_v41, 16  ;;  %v2296_v60 = vcombine.low %v492_v58, %v316_v38  ;;  %v507_v63 = vrot.slane %v3136_v41, 1  ;;  %2970 = vmatprep.subr.bf16.mxu1 %v3204_v16  ;;  %v3469_v38 = vld [vmem:[%s3767_s5] sm:$0xff] }
  0x22   : > { %v345_v44 = vshrl.u32 %v2276_v40, 16  ;;  %v347_v45 = vshll.u32 %v2276_v40, 16 }
  0x23   : > { %v354_v48 = vrot.slane %v352_v46, 1  ;;  %v506_v62 = vrot.slane %v2296_v60, 1  ;;  %v3149_v60 = vld [vmem:[%s3764_s2 + $0x58] sm:$0xff]  }
  0x24   : > { %v349_v47 = vrot.slane %v347_v45, 1  ;;  %2972 = vmatpush3.bf16.msra.mxu1 %v3406_v10 }
  0x25   : > { %v508_v0 = vsel %vm505_vm12, %v506_v62, %v507_v63  ;;  %2973 = vmatprep.subr.bf16.mxu1 %v3204_v16  ;;  %v3151_v62 = vld [vmem:[%s3764_s2 + $0x68] sm:$0xff]   ;;  %v3152_v63 = vld [vmem:[%s3764_s2 + $0x70] sm:$0xff]  }
  0x26   : > { %v350_v51 = vor.u32 %v349_v47, %v345_v44 }
  0x28   : > { %v355_v52 = vsel %vm343_vm10, %v350_v51, %v354_v48  ;;  %2975 = vmatpush3.bf16.msra.mxu1 %v3416_v13 }
  0x29   : > { %2589 = vmatmul.mubr.msk.bf16.vlgmr.msra.gmra.mrb[0].mxu0 %vm380_vm11, %v355_v52  ;;  %2976 = vmatprep.subr.bf16.mxu1 %v3204_v16  ;;  %v3146_v52 = vld [vmem:[%s3764_s2 + $0x40] sm:$0xff]  }
  0x2a   : > { %2593 = vmatpush3.bf16.msra.mxu0 %v3137_v49  ;;  %2600 = vmatprep.mubr.msk.bf16.mxu0 %vm3203_vm0, %v3202_v1 }
  0x2b   : > { %2594 = vmatprep.subr.bf16.mxu0 %v3202_v1 }
  0x2e   : > { %2595 = vmatpush3.bf16.msra.mxu0 %v3138_v53  ;;  %v3147_v53 = vld [vmem:[%s3764_s2 + $0x48] sm:$0xff]  }
  0x2f   : > { %2596 = vmatprep.subr.bf16.mxu0 %v3202_v1 }
  0x32   : > { %2597 = vmatpush3.bf16.msra.mxu0 %v3139_v54 }
  0x33   : > { %2598 = vmatprep.subr.bf16.mxu0 %v3202_v1 }
  0x36   : > { %2599 = vmatpush3.bf16.msra.mxu0 %v3140_v55  ;;  %v903_v55 = vld [vmem:[#allocation3] sm:$0x1] }
  0x37   : > { %2604 = vmatprep.subr.bf16.mxu0 %v3202_v1 }
  0x39   : > { %2601 = vmatmul.mubr.msk.bf16.vlgmr.msra.gmra.mrb[0].mxu0 %vm380_vm11, %v2276_v40 }
  0x3a   : > { %2605 = vmatpush3.bf16.msra.mxu0 %v3141_v56  ;;  %2612 = vmatprep.mubr.msk.bf16.mxu0 %vm3203_vm0, %v3202_v1  ;;  %v907_v56 = vld [vmem:[#allocation3 + $0x8] sm:$0x1] }
  0x3b   : > { %2606 = vmatprep.subr.bf16.mxu0 %v3202_v1  ;;  %v908_v58 = vsel %vm906_vm1, 0, %v907_v56 }
  0x3c   : > { %909 = vst [vmem:[#allocation3 + $0x8] sm:$0x1] %v908_v58 }
  0x3e   : > { %2607 = vmatpush3.bf16.msra.mxu0 %v3142_v57  ;;  %v904_v57 = vsel %vm3489_vm15, 0, %v903_v55 }
  0x3f   : > { %2608 = vmatprep.subr.bf16.mxu0 %v3202_v1  ;;  %905 = vst [vmem:[#allocation3] sm:$0x1] %v904_v57  ;;  %v3156_v57 = vld [vmem:[%s3764_s2] sm:$0xff]  }
  0x42   : > { %2609 = vmatpush3.bf16.msra.mxu0 %v3143_v59  ;;  %v3148_v59 = vld [vmem:[%s3764_s2 + $0x50] sm:$0xff]  }
  0x43   : > { %2610 = vmatprep.subr.bf16.mxu0 %v3202_v1 }
  0x46   : > { %2611 = vmatpush3.bf16.msra.mxu0 %v3144_v61  ;;  %v3150_v61 = vld [vmem:[%s3764_s2 + $0x60] sm:$0xff]  }
  0x47   : > { %2686 = vmatprep.subr.mxu0 %v3202_v1 }
  0x49   : > { %2613 = vmatmul.mubr.msk.bf16.vlgmr.msra.gmra.mrb[0].mxu0 %vm380_vm11, %v508_v0  ;;  %v3153_v0 = vld [vmem:[%s3764_s2 + $0x78] sm:$0xff]  }
  0x4a   : > { %2688 = vmatprep.mubr.msk.f32.mxu0 %vm3203_vm0, %v3202_v1  ;;  %2687 = vmatpush3.msra.mxu0 %v3469_v38 }
  0x4b   : > { %2691 = vmatprep.subr.mxu0 %v3202_v1 }
 0x11c   : > { %v3420_v14 = vpop.f32.mrb[0].mxu0 }
 0x11d   : > { %v2614_v15 = vpop.f32.mrb[1].mxu0  ;;  %v656_v19 = vmul.f32 %v3420_v14, %v3420_v14 }
 0x11e   : > { %v3422_v18 = vpop.f32.mrb[2].mxu0 }
 0x11f   : > { %v579_v20 = vadd.f32 %v3422_v18, %v3420_v14  ;;  %v657_v21 = vmul.f32 %v3422_v18, %v3422_v18  ;;  %v2615_v22 = vpop.f32.mrb[3].mxu0 }
 0x121   : > { %v580_v23 = vrot.slane %v579_v20, 4  ;;  %v658_v24 = vadd.f32 %v657_v21, %v656_v19 }
 0x123   : > { %v581_v25 = vadd.f32 %v580_v23, %v579_v20  ;;  %v659_v30 = vrot.slane %v658_v24, 4 }
 0x125   : > { %v582_v26 = vrot.slane %v581_v25, 2  ;;  %v660_v32 = vadd.f32 %v659_v30, %v658_v24 }
 0x127   : > { %v583_v27 = vadd.f32 %v582_v26, %v581_v25  ;;  %v661_v33 = vrot.slane %v660_v32, 2 }
 0x129   : > { %v584_v28 = vrot.slane %v583_v27, 1  ;;  %v662_v34 = vadd.f32 %v661_v33, %v660_v32  ;;  %v942_v32 = vld [vmem:[#allocation3 + $0x8] sm:$0x1] }
 0x12b   : > { %v585_v29 = vadd.f32 %v584_v28, %v583_v27  ;;  %v663_v35 = vrot.slane %v662_v34, 1 }
 0x12d   : > { %2649 = vmatmul.mubr.f32.vlgmr.msra.gmra.mrb[0].mxu1 %v585_v29  ;;  %v664_v37 = vadd.f32 %v663_v35, %v662_v34 }
 0x12e   : > { %2978 = vmatpush3.bf16.msra.mxu1 %v3303_v31  ;;  %2683 = vmatprep.mubr.msk.f32.mxu1 %vm3203_vm0, %v3202_v1 }
 0x12f   : > { %2979 = vmatprep.subr.bf16.mxu1 %v3204_v16 }
 0x132   : > { %2981 = vmatpush3.bf16.msra.mxu1 %v3318_v36 }
 0x133   : > { %2982 = vmatprep.subr.bf16.mxu1 %v3204_v16 }
 0x136   : > { %2984 = vmatpush3.bf16.msra.mxu1 %v3325_v42 }
 0x137   : > { %2985 = vmatprep.subr.bf16.mxu1 %v3204_v16 }
 0x13a   : > { %2987 = vmatpush3.bf16.msra.mxu1 %v3335_v50 }
 0x13b   : > { %2988 = vmatprep.subr.bf16.mxu1 %v3204_v16 }
 0x13e   : > { %2990 = vmatpush3.bf16.msra.mxu1 %v3386_v4 }
 0x13f   : > { %2991 = vmatprep.subr.bf16.mxu1 %v3204_v16 }
 0x142   : > { %2993 = vmatpush3.bf16.msra.mxu1 %v3396_v7 }
 0x143   : > { %2994 = vmatprep.subr.bf16.mxu1 %v3204_v16 }
 0x146   : > { %2996 = vmatpush3.bf16.msra.mxu1 %v3406_v10 }
 0x147   : > { %2997 = vmatprep.subr.bf16.mxu1 %v3204_v16 }
 0x14a   : > { %2999 = vmatpush3.bf16.msra.mxu1 %v3416_v13 }
 0x14b   : > { %3000 = vmatprep.subr.bf16.mxu1 %v3204_v16 }
 0x14d   : > { %2684 = vmatmul.mubr.f32.vlgmr.msra.gmra.mrb[2].mxu1 %v664_v37 }
 0x14e   : > { %3002 = vmatpush3.bf16.msra.mxu1 %v3303_v31  ;;  %2788 = vmatprep.mubr.msk.f32.mxu1 %vm3203_vm0, %v3202_v1 }
 0x14f   : > { %3003 = vmatprep.subr.bf16.mxu1 %v3204_v16 }
 0x152   : > { %3005 = vmatpush3.bf16.msra.mxu1 %v3318_v36 }
 0x153   : > { %3006 = vmatprep.subr.bf16.mxu1 %v3204_v16 }
 0x156   : > { %3008 = vmatpush3.bf16.msra.mxu1 %v3325_v42 }
 0x157   : > { %3009 = vmatprep.subr.bf16.mxu1 %v3204_v16 }
 0x15a   : > { %3011 = vmatpush3.bf16.msra.mxu1 %v3335_v50 }
 0x15b   : > { %3012 = vmatprep.subr.bf16.mxu1 %v3204_v16 }
 0x15e   : > { %3014 = vmatpush3.bf16.msra.mxu1 %v3386_v4 }
 0x15f   : > { %3015 = vmatprep.subr.bf16.mxu1 %v3204_v16 }
 0x162   : > { %3017 = vmatpush3.bf16.msra.mxu1 %v3396_v7 }
 0x163   : > { %3018 = vmatprep.subr.bf16.mxu1 %v3204_v16 }
 0x166   : > { %3020 = vmatpush3.bf16.msra.mxu1 %v3406_v10 }
 0x167   : > { %3021 = vmatprep.subr.bf16.mxu1 %v3204_v16 }
 0x16a   : > { %3023 = vmatpush3.bf16.msra.mxu1 %v3416_v13 }
 0x16b   : > { %3024 = vmatprep.subr.bf16.mxu1 %v3204_v16 }
 0x200   : > { %v652_v39 = vpop.f32.mrb[0].mxu1 }
 0x201   : > { %v735_v40 = vmul.f32 0.00390625, %v652_v39  ;;  %v2650_v41 = vpop.f32.mrb[1].mxu1 }
 0x203   : > { %2689 = vmatmul.mubr.msk.f32.vlgmr.msra.gmra.mrb[4].mxu0 %vm742_vm13, %v735_v40  ;;  %v737_v44 = vmul.f32 %v735_v40, %v735_v40 }
 0x204   : > { %2692 = vmatpush3.msra.mxu0 %v3469_v38  ;;  %2693 = vmatprep.mubr.msk.f32.mxu0 %vm3203_vm0, %v3202_v1 }
 0x205   : > { %2696 = vmatprep.subr.bf16.mxu0 %v3202_v1 }
 0x220   : > { %v731_v43 = vpop.f32.mrb[2].mxu1 }
 0x221   : > { %v736_v45 = vmul.f32 0.00390625, %v731_v43  ;;  %v2685_v46 = vpop.f32.mrb[3].mxu1 }
 0x223   : > { %v738_v47 = vsub.f32 %v736_v45, %v737_v44 }
 0x225   : > { %v739_v48 = vmax.f32 %v738_v47, 0.0 }
 0x227   : > { %v740_v49 = vadd.f32 1e-05, %v739_v48 }
 0x229   : > { %3188 = vrsqrt.f32 %v740_v49 }
 0x233   : > { %v3189_v51 = vpop.eup %3188 }
 0x234   : > { %2694 = vmatmul.mubr.msk.f32.vlgmr.msra.gmra.mrb[6].mxu0 %vm742_vm13, %v3189_v51 }
 0x235   : > { %2712 = vmatprep.mubr.msk.bf16.mxu0 %vm3203_vm0, %v3202_v1  ;;  %2697 = vmatpush3.bf16.msra.mxu0 %v3146_v52 }
 0x236   : > { %2698 = vmatprep.subr.bf16.mxu0 %v3202_v1 }
 0x239   : > { %2699 = vmatpush3.bf16.msra.mxu0 %v3147_v53 }
 0x23a   : > { %2700 = vmatprep.subr.bf16.mxu0 %v3202_v1 }
 0x23d   : > { %2701 = vmatpush3.bf16.msra.mxu0 %v3148_v59  ;;  %v3157_v59 = vld [vmem:[%s3764_s2 + $0x8] sm:$0xff]  }
 0x23e   : > { %2702 = vmatprep.subr.bf16.mxu0 %v3202_v1 }
 0x241   : > { %2703 = vmatpush3.bf16.msra.mxu0 %v3149_v60  ;;  %v3158_v60 = vld [vmem:[%s3764_s2 + $0x10] sm:$0xff]  }
 0x242   : > { %2704 = vmatprep.subr.bf16.mxu0 %v3202_v1 }
 0x245   : > { %2705 = vmatpush3.bf16.msra.mxu0 %v3150_v61  ;;  %v3159_v61 = vld [vmem:[%s3764_s2 + $0x18] sm:$0xff]  }
 0x246   : > { %2706 = vmatprep.subr.bf16.mxu0 %v3202_v1 }
 0x249   : > { %2707 = vmatpush3.bf16.msra.mxu0 %v3151_v62  ;;  %v3160_v62 = vld [vmem:[%s3764_s2 + $0x20] sm:$0xff]  }
 0x24a   : > { %2708 = vmatprep.subr.bf16.mxu0 %v3202_v1 }
 0x24d   : > { %2709 = vmatpush3.bf16.msra.mxu0 %v3152_v63  ;;  %v3161_v63 = vld [vmem:[%s3764_s2 + $0x28] sm:$0xff]  }
 0x24e   : > { %2710 = vmatprep.subr.bf16.mxu0 %v3202_v1 }
 0x251   : > { %2711 = vmatpush3.bf16.msra.mxu0 %v3153_v0  ;;  %v3162_v0 = vld [vmem:[%s3764_s2 + $0x30] sm:$0xff]  }
 0x252   : > { %2716 = vmatprep.subr.bf16.mxu0 %v3202_v1 }
 0x2d6   : > { %v812_v6 = vpop.f32.mrb[4].mxu0 }
 0x2d7   : > { %v892_v8 = vrot.slane %v812_v6, %v3521_v5  ;;  %v2690_v9 = vpop.f32.mrb[5].mxu0  ;;  %v3165_v6 = vld [vmem:[%s3764_s2 + $0x88] sm:$0xff]  }
 0x2d8   : > { %v3167_v9 = vld [vmem:[%s3764_s2 + $0x98] sm:$0xff]  }
 0x2d9   : > { %v893_v11 = vsub.f32 %v3420_v14, %v892_v8  ;;  %v894_v12 = vsub.f32 %v3422_v18, %v892_v8  ;;  %v938_v14 = vld [vmem:[#allocation3] sm:$0xf]  ;;  %v3166_v8 = vld [vmem:[%s3764_s2 + $0x90] sm:$0xff]  }
 0x307   : > { %v885_v15 = vpop.f32.mrb[6].mxu0 }
 0x308   : > { %v898_v19 = vrot.slane %v885_v15, %v3521_v5  ;;  %v2695_v20 = vpop.f32.mrb[7].mxu0  ;;  %v3170_v15 = vld [vmem:[%s3764_s2 + $0xb0] sm:$0xff]  }
 0x30a   : > { %v899_v21 = vmul.f32 %v898_v19, %v893_v11  ;;  %v900_v22 = vmul.f32 %v898_v19, %v894_v12  ;;  %v3168_v11 = vld [vmem:[%s3764_s2 + $0xa0] sm:$0xff]   ;;  %v3169_v12 = vld [vmem:[%s3764_s2 + $0xa8] sm:$0xff]   ;;  %v3171_v19 = vld [vmem:[%s3764_s2 + $0xb8] sm:$0xff]  }
 0x30c   : > { %v2407_v23 = vpack.c.bf16 %v899_v21, %v899_v21  ;;  %v2408_v24 = vpack.c.bf16 %v900_v22, %v900_v22 }
 0x30e   : > { %v917_v25 = vshrl.u32 %v2407_v23, 16  ;;  %v925_v26 = vshrl.u32 %v2408_v24, 16  ;;  %v920_v28 = vshll.u32 %v2407_v23, 16  ;;  %v928_v30 = vshll.u32 %v2408_v24, 16 }
 0x310   : > { %v919_v27 = vrot.slane %v917_v25, 7  ;;  %v927_v29 = vrot.slane %v925_v26, 7 }
 0x312   : > { %v922_v18 = vor.u32 %v920_v28, %v919_v27  ;;  %v923_v33 = vrot.slane %v919_v27, 4  ;;  %v930_v34 = vor.u32 %v928_v30, %v927_v29  ;;  %v932_v35 = vrot.slane %v927_v29, 4 }
 0x314   : > { %v931_v37 = vsel %vm3284_vm8, %v923_v33, %v930_v34  ;;  %v939_v39 = vsel %vm937_vm3, %v922_v18, %v938_v14  ;;  %v943_v40 = vsel %vm3489_vm15, %v932_v35, %v942_v32 }
 0x315   : > { %940 = vst [vmem:[#allocation3] sm:$0xf] %v939_v39  ;;  %941 = vst [vmem:[#allocation3 + $0x4] sm:$0xf] %v931_v37 }
 0x316   : > { %944 = vst [vmem:[#allocation3 + $0x8] sm:$0x1] %v943_v40  ;;  %v1618_v40 = vld [vmem:[#allocation2] sm:$0xf] }
 0x31c   : > { %v945_v41 = vld [vmem:[#allocation3] sm:$0xf]  ;;  %v946_v43 = vld [vmem:[#allocation3 + $0x4] sm:$0xf] }
 0x31d   : > { %v2322_v44 = vcombine.low %v945_v41, %v946_v43  ;;  %v3155_v45 = vld [vmem:[#allocation3 + $0x8] ss:$0 sps:$4 sm:$0x11]   ;;  %v1181_v46 = vld [vmem:[#allocation3] sm:$0xe] }
 0x31e   : > { %v2356_v47 = vcombine.low %v1181_v46, %v946_v43  ;;  %v997_v49 = vshll.u32 %v3155_v45, 16  ;;  %v1203_v51 = vrot.slane %v3155_v45, 1  ;;  %v1619_v41 = vld [vmem:[#allocation2 + $0x4] sm:$0xf]  ;;  %v3174_v46 = vld [vmem:[%s3765_s3 + $0x28] sm:$0xff]  }
 0x31f   : > { %v992_v48 = vshll.u32 %v2322_v44, 16  ;;  %v990_v53 = vshrl.u32 %v2322_v44, 16  ;;  %v3173_v43 = vld [vmem:[%s3765_s3 + $0x20] sm:$0xff]  }
 0x320   : > { %v1202_v52 = vrot.slane %v2356_v47, 1  ;;  %v999_v54 = vrot.slane %v997_v49, 1  ;;  %v3178_v47 = vld [vmem:[#allocation2 + $0x8] ss:$0 sps:$4 sm:$0x11]   ;;  %v3175_v49 = vld [vmem:[%s3765_s3 + $0x30] sm:$0xff]  }
 0x321   : > { %v994_v17 = vrot.slane %v992_v48, 1 }
 0x322   : > { %v1204_v55 = vsel %vm505_vm12, %v1202_v52, %v1203_v51 }
 0x323   : > { %v995_v56 = vor.u32 %v994_v17, %v990_v53  ;;  %v1654_v53 = vshll.u32 %v3178_v47, 16  ;;  %v3176_v17 = vld [vmem:[%s3765_s3 + $0x38] sm:$0xff]  }
 0x325   : > { %v1000_v58 = vsel %vm343_vm10, %v995_v56, %v999_v54  ;;  %v1656_v56 = vrot.slane %v1654_v53, 1 }
 0x326   : > { %2713 = vmatmul.mubr.bf16.vlgmr.msra.gmra.mrb[8].mxu0 %v1000_v58  ;;  %v3180_v58 = vld [vmem:[%s3765_s3 + $0x8] sm:$0xff]  }
 0x327   : > { %2717 = vmatpush3.bf16.msra.mxu0 %v3156_v57  ;;  %2732 = vmatprep.mubr.msk.bf16.mxu0 %vm3203_vm0, %v3202_v1  ;;  %v3179_v57 = vld [vmem:[%s3765_s3] sm:$0xff]  }
 0x328   : > { %2718 = vmatprep.subr.bf16.mxu0 %v3202_v1 }
 0x32b   : > { %2719 = vmatpush3.bf16.msra.mxu0 %v3157_v59  ;;  %v3181_v59 = vld [vmem:[%s3765_s3 + $0x10] sm:$0xff]  }
 0x32c   : > { %2720 = vmatprep.subr.bf16.mxu0 %v3202_v1 }
 0x32f   : > { %2721 = vmatpush3.bf16.msra.mxu0 %v3158_v60  ;;  %v3182_v60 = vld [vmem:[%s3765_s3 + $0x18] sm:$0xff]  }
 0x330   : > { %2722 = vmatprep.subr.bf16.mxu0 %v3202_v1 }
 0x333   : > { %2723 = vmatpush3.bf16.msra.mxu0 %v3159_v61  ;;  %v3183_v61 = vld [vmem:[%s3765_s3 + $0x40] sm:$0xff]  }
 0x334   : > { %2724 = vmatprep.subr.bf16.mxu0 %v3202_v1 }
 0x337   : > { %2725 = vmatpush3.bf16.msra.mxu0 %v3160_v62  ;;  %v3184_v62 = vld [vmem:[%s3765_s3 + $0x48] sm:$0xff]  }
 0x338   : > { %2726 = vmatprep.subr.bf16.mxu0 %v3202_v1 }
 0x33b   : > { %2727 = vmatpush3.bf16.msra.mxu0 %v3161_v63  ;;  %v1793_v63 = vld [vmem:[#allocation2] sm:$0xe] }
 0x33c   : > { %2728 = vmatprep.subr.bf16.mxu0 %v3202_v1 }
 0x33f   : > { %2729 = vmatpush3.bf16.msra.mxu0 %v3162_v0  ;;  %v3185_v0 = vld [vmem:[%s3765_s3 + $0x50] sm:$0xff]  }
 0x340   : > { %2730 = vmatprep.subr.bf16.mxu0 %v3202_v1 }
 0x343   : > { %2731 = vmatpush3.bf16.msra.mxu0 %v3163_v2  ;;  %v2395_v2 = vcombine.low %v1793_v63, %v1619_v41 }
 0x344   : > { %2736 = vmatprep.subr.bf16.mxu0 %v3202_v1 }
 0x346   : > { %2733 = vmatmul.mubr.bf16.vlgmr.msra.gmra.mrb[8].mxu0 %v2322_v44  ;;  %v2375_v44 = vcombine.low %v1618_v40, %v1619_v41 }
 0x347   : > { %2737 = vmatpush3.bf16.msra.mxu0 %v3164_v3  ;;  %2752 = vmatprep.mubr.msk.bf16.mxu0 %vm3203_vm0, %v3202_v1  ;;  %v3186_v3 = vld [vmem:[%s3765_s3 + $0x58] sm:$0xff]  }
 0x348   : > { %2738 = vmatprep.subr.bf16.mxu0 %v3202_v1  ;;  %v1649_v48 = vshll.u32 %v2375_v44, 16  ;;  %v1647_v51 = vshrl.u32 %v2375_v44, 16 }
 0x34a   : > { %v1651_v52 = vrot.slane %v1649_v48, 1 }
 0x34b   : > { %2739 = vmatpush3.bf16.msra.mxu0 %v3165_v6  ;;  %v1806_v6 = vrot.slane %v2395_v2, 1 }
 0x34c   : > { %2740 = vmatprep.subr.bf16.mxu0 %v3202_v1 }
 0x34f   : > { %2741 = vmatpush3.bf16.msra.mxu0 %v3166_v8  ;;  %v1807_v8 = vrot.slane %v3178_v47, 1 }
 0x350   : > { %2742 = vmatprep.subr.bf16.mxu0 %v3202_v1 }
 0x353   : > { %2743 = vmatpush3.bf16.msra.mxu0 %v3167_v9  ;;  %v1808_v9 = vsel %vm505_vm12, %v1806_v6, %v1807_v8 }
 0x354   : > { %2744 = vmatprep.subr.bf16.mxu0 %v3202_v1 }
 0x357   : > { %2745 = vmatpush3.bf16.msra.mxu0 %v3168_v11 }
 0x358   : > { %2746 = vmatprep.subr.bf16.mxu0 %v3202_v1 }
 0x35b   : > { %2747 = vmatpush3.bf16.msra.mxu0 %v3169_v12 }
 0x35c   : > { %2748 = vmatprep.subr.bf16.mxu0 %v3202_v1 }
 0x35f   : > { %2749 = vmatpush3.bf16.msra.mxu0 %v3170_v15 }
 0x360   : > { %2750 = vmatprep.subr.bf16.mxu0 %v3202_v1 }
 0x363   : > { %2751 = vmatpush3.bf16.msra.mxu0 %v3171_v19 }
 0x364   : > { %2826 = vmatprep.subr.mxu0 %v3202_v1 }
 0x366   : > { %2753 = vmatmul.mubr.bf16.vlgmr.msra.gmra.mrb[8].mxu0 %v1204_v55  ;;  %v1652_v55 = vor.u32 %v1651_v52, %v1647_v51 }
 0x367   : > { %2827 = vmatpush3.msra.mxu0 %v3469_v38  ;;  %2828 = vmatprep.mubr.msk.f32.mxu0 %vm3203_vm0, %v3202_v1 }
 0x368   : > { %2831 = vmatprep.subr.mxu0 %v3202_v1  ;;  %v1657_v54 = vsel %vm343_vm10, %v1652_v55, %v1656_v56 }
 0x439   : > { %v3606_v20 = vpop.f32.mrb[8].mxu0 }
 0x43a   : > { %v2754_v21 = vpop.f32.mrb[9].mxu0  ;;  %v1374_v23 = vmul.f32 %v3606_v20, %v3606_v20 }
 0x43b   : > { %v3608_v22 = vpop.f32.mrb[10].mxu0 }
 0x43c   : > { %v1297_v24 = vadd.f32 %v3608_v22, %v3606_v20  ;;  %v1375_v25 = vmul.f32 %v3608_v22, %v3608_v22  ;;  %v2755_v26 = vpop.f32.mrb[11].mxu0 }
 0x43e   : > { %v1298_v27 = vrot.slane %v1297_v24, 4  ;;  %v1376_v28 = vadd.f32 %v1375_v25, %v1374_v23 }
 0x440   : > { %v1299_v29 = vadd.f32 %v1298_v27, %v1297_v24  ;;  %v1377_v33 = vrot.slane %v1376_v28, 4 }
 0x442   : > { %v1300_v30 = vrot.slane %v1299_v29, 2  ;;  %v1378_v34 = vadd.f32 %v1377_v33, %v1376_v28 }
 0x444   : > { %v1301_v14 = vadd.f32 %v1300_v30, %v1299_v29  ;;  %v1379_v35 = vrot.slane %v1378_v34, 2 }
 0x446   : > { %v1302_v32 = vrot.slane %v1301_v14, 1  ;;  %v1380_v37 = vadd.f32 %v1379_v35, %v1378_v34 }
 0x448   : > { %v1303_v18 = vadd.f32 %v1302_v32, %v1301_v14  ;;  %v1381_v39 = vrot.slane %v1380_v37, 1 }
 0x44a   : > { %2789 = vmatmul.mubr.f32.vlgmr.msra.gmra.mrb[4].mxu1 %v1303_v18  ;;  %v1382_v45 = vadd.f32 %v1381_v39, %v1380_v37 }
 0x44b   : > { %3026 = vmatpush3.bf16.msra.mxu1 %v3303_v31  ;;  %2823 = vmatprep.mubr.msk.f32.mxu1 %vm3203_vm0, %v3202_v1 }
 0x44c   : > { %3027 = vmatprep.subr.bf16.mxu1 %v3204_v16 }
 0x44f   : > { %3029 = vmatpush3.bf16.msra.mxu1 %v3318_v36 }
 0x450   : > { %3030 = vmatprep.subr.bf16.mxu1 %v3204_v16 }
 0x453   : > { %3032 = vmatpush3.bf16.msra.mxu1 %v3325_v42 }
 0x454   : > { %3033 = vmatprep.subr.bf16.mxu1 %v3204_v16 }
 0x457   : > { %3035 = vmatpush3.bf16.msra.mxu1 %v3335_v50 }
 0x458   : > { %3036 = vmatprep.subr.bf16.mxu1 %v3204_v16 }
 0x45b   : > { %3038 = vmatpush3.bf16.msra.mxu1 %v3386_v4 }
 0x45c   : > { %3039 = vmatprep.subr.bf16.mxu1 %v3204_v16 }
 0x45f   : > { %3041 = vmatpush3.bf16.msra.mxu1 %v3396_v7 }
 0x460   : > { %3042 = vmatprep.subr.bf16.mxu1 %v3204_v16 }
 0x463   : > { %3044 = vmatpush3.bf16.msra.mxu1 %v3406_v10 }
 0x464   : > { %3045 = vmatprep.subr.bf16.mxu1 %v3204_v16 }
 0x467   : > { %3047 = vmatpush3.bf16.msra.mxu1 %v3416_v13 }
 0x468   : > { %2836 = vmatprep.subr.bf16.mxu1 %v3202_v1 }
 0x46a   : > { %2824 = vmatmul.mubr.f32.vlgmr.msra.gmra.mrb[6].mxu1 %v1382_v45 }
 0x46b   : > { %2837 = vmatpush3.bf16.msra.mxu1 %v3173_v43  ;;  %2844 = vmatprep.mubr.msk.bf16.mxu1 %vm3203_vm0, %v3202_v1 }
 0x46c   : > { %2838 = vmatprep.subr.bf16.mxu1 %v3202_v1 }
 0x46f   : > { %2839 = vmatpush3.bf16.msra.mxu1 %v3174_v46 }
 0x470   : > { %2840 = vmatprep.subr.bf16.mxu1 %v3202_v1 }
 0x473   : > { %2841 = vmatpush3.bf16.msra.mxu1 %v3175_v49 }
 0x474   : > { %2842 = vmatprep.subr.bf16.mxu1 %v3202_v1 }
 0x477   : > { %2843 = vmatpush3.bf16.msra.mxu1 %v3176_v17 }
 0x478   : > { %2848 = vmatprep.subr.bf16.mxu1 %v3202_v1 }
 0x47a   : > { %2845 = vmatmul.mubr.msk.bf16.vlgmr.msra.gmra.mrb[8].mxu1 %vm380_vm11, %v1657_v54 }
 0x47b   : > { %2849 = vmatpush3.bf16.msra.mxu1 %v3179_v57  ;;  %2856 = vmatprep.mubr.msk.bf16.mxu1 %vm3203_vm0, %v3202_v1 }
 0x47c   : > { %2850 = vmatprep.subr.bf16.mxu1 %v3202_v1 }
 0x47f   : > { %2851 = vmatpush3.bf16.msra.mxu1 %v3180_v58 }
 0x480   : > { %2852 = vmatprep.subr.bf16.mxu1 %v3202_v1 }
 0x483   : > { %2853 = vmatpush3.bf16.msra.mxu1 %v3181_v59 }
 0x484   : > { %2854 = vmatprep.subr.bf16.mxu1 %v3202_v1 }
 0x487   : > { %2855 = vmatpush3.bf16.msra.mxu1 %v3182_v60 }
 0x488   : > { %2860 = vmatprep.subr.bf16.mxu1 %v3202_v1 }
 0x48a   : > { %2857 = vmatmul.mubr.msk.bf16.vlgmr.msra.gmra.mrb[8].mxu1 %vm380_vm11, %v2375_v44 }
 0x48b   : > { %2861 = vmatpush3.bf16.msra.mxu1 %v3183_v61  ;;  %2868 = vmatprep.mubr.msk.bf16.mxu1 %vm3203_vm0, %v3202_v1 }
 0x48c   : > { %2862 = vmatprep.subr.bf16.mxu1 %v3202_v1 }
 0x48f   : > { %2863 = vmatpush3.bf16.msra.mxu1 %v3184_v62 }
 0x490   : > { %2864 = vmatprep.subr.bf16.mxu1 %v3202_v1 }
 0x493   : > { %2865 = vmatpush3.bf16.msra.mxu1 %v3185_v0 }
 0x494   : > { %2866 = vmatprep.subr.bf16.mxu1 %v3202_v1 }
 0x497   : > { %2867 = vmatpush3.bf16.msra.mxu1 %v3186_v3 }
 0x498   : > { %3072 = vmatprep.subr.bf16.mxu1 %v3204_v16 }
 0x49a   : > { %2869 = vmatmul.mubr.msk.bf16.vlgmr.msra.gmra.mrb[8].mxu1 %vm380_vm11, %v1808_v9 }
 0x49b   : > { %3074 = vmatpush3.bf16.msra.mxu1 %v3303_v31  ;;  %2939 = vmatprep.mubr.msk.f32.mxu1 %vm3203_vm0, %v3202_v1 }
 0x49c   : > { %3075 = vmatprep.subr.bf16.mxu1 %v3204_v16 }
 0x49f   : > { %3077 = vmatpush3.bf16.msra.mxu1 %v3318_v36 }
 0x4a0   : > { %3078 = vmatprep.subr.bf16.mxu1 %v3204_v16 }
 0x4a3   : > { %3080 = vmatpush3.bf16.msra.mxu1 %v3325_v42 }
 0x4a4   : > { %3081 = vmatprep.subr.bf16.mxu1 %v3204_v16 }
 0x4a7   : > { %3083 = vmatpush3.bf16.msra.mxu1 %v3335_v50 }
 0x4a8   : > { %3084 = vmatprep.subr.bf16.mxu1 %v3204_v16 }
 0x4ab   : > { %3086 = vmatpush3.bf16.msra.mxu1 %v3386_v4 }
 0x4ac   : > { %3087 = vmatprep.subr.bf16.mxu1 %v3204_v16 }
 0x4af   : > { %3089 = vmatpush3.bf16.msra.mxu1 %v3396_v7 }
 0x4b0   : > { %3090 = vmatprep.subr.bf16.mxu1 %v3204_v16 }
 0x4b3   : > { %3092 = vmatpush3.bf16.msra.mxu1 %v3406_v10 }
 0x4b4   : > { %3093 = vmatprep.subr.bf16.mxu1 %v3204_v16 }
 0x4b7   : > { %3095 = vmatpush3.bf16.msra.mxu1 %v3416_v13 }
 0x51d   : > { %v1370_v11 = vpop.f32.mrb[4].mxu1 }
 0x51e   : > { %v1453_v12 = vmul.f32 0.00390625, %v1370_v11  ;;  %v2790_v15 = vpop.f32.mrb[5].mxu1 }
 0x520   : > { %2829 = vmatmul.mubr.msk.f32.vlgmr.msra.gmra.mrb[12].mxu0 %vm742_vm13, %v1453_v12  ;;  %v1455_v21 = vmul.f32 %v1453_v12, %v1453_v12 }
 0x521   : > { %2832 = vmatpush3.msra.mxu0 %v3469_v38  ;;  %2833 = vmatprep.mubr.msk.f32.mxu0 %vm3203_vm0, %v3202_v1 }
 0x522   : > { %3048 = vmatprep.subr.bf16.mxu0 %v3204_v16 }
 0x53d   : > { %v1449_v19 = vpop.f32.mrb[6].mxu1 }
 0x53e   : > { %v1454_v23 = vmul.f32 0.00390625, %v1449_v19  ;;  %v2825_v24 = vpop.f32.mrb[7].mxu1 }
 0x540   : > { %v1456_v25 = vsub.f32 %v1454_v23, %v1455_v21 }
 0x542   : > { %v1457_v26 = vmax.f32 %v1456_v25, 0.0 }
 0x544   : > { %v1458_v27 = vadd.f32 1e-05, %v1457_v26 }
 0x546   : > { %3190 = vrsqrt.f32 %v1458_v27 }
 0x550   : > { %v3191_v28 = vpop.eup %3190 }
 0x551   : > { %2834 = vmatmul.mubr.msk.f32.vlgmr.msra.gmra.mrb[14].mxu0 %vm742_vm13, %v3191_v28 }
 0x552   : > { %3050 = vmatpush3.bf16.msra.mxu0 %v3303_v31  ;;  %2904 = vmatprep.mubr.msk.f32.mxu0 %vm3203_vm0, %v3202_v1 }
 0x553   : > { %3051 = vmatprep.subr.bf16.mxu0 %v3204_v16 }
 0x556   : > { %3053 = vmatpush3.bf16.msra.mxu0 %v3318_v36 }
 0x557   : > { %3054 = vmatprep.subr.bf16.mxu0 %v3204_v16 }
 0x55a   : > { %3056 = vmatpush3.bf16.msra.mxu0 %v3325_v42 }
 0x55b   : > { %3057 = vmatprep.subr.bf16.mxu0 %v3204_v16 }
 0x55e   : > { %3059 = vmatpush3.bf16.msra.mxu0 %v3335_v50 }
 0x55f   : > { %3060 = vmatprep.subr.bf16.mxu0 %v3204_v16 }
 0x562   : > { %3062 = vmatpush3.bf16.msra.mxu0 %v3386_v4 }
 0x563   : > { %3063 = vmatprep.subr.bf16.mxu0 %v3204_v16 }
 0x566   : > { %3065 = vmatpush3.bf16.msra.mxu0 %v3396_v7 }
 0x567   : > { %3066 = vmatprep.subr.bf16.mxu0 %v3204_v16 }
 0x56a   : > { %3068 = vmatpush3.bf16.msra.mxu0 %v3406_v10 }
 0x56b   : > { %3069 = vmatprep.subr.bf16.mxu0 %v3204_v16 }
 0x56d   : > { %v3732_v31 = vpop.f32.mrb[8].mxu1 }
 0x56e   : > { %v2870_v36 = vpop.f32.mrb[9].mxu1  ;;  %3071 = vmatpush3.bf16.msra.mxu0 %v3416_v13  ;;  %v1956_v50 = vmul.f32 %v3732_v31, %v3732_v31 }
 0x56f   : > { %v1873_v42 = vpop.f32.mrb[10].mxu1  ;;  %2942 = vmatprep.subr.mxu0 %v3202_v1 }
 0x570   : > { %v1879_v4 = vadd.f32 %v1873_v42, %v3732_v31  ;;  %v1957_v7 = vmul.f32 %v1873_v42, %v1873_v42  ;;  %v2871_v29 = vpop.f32.mrb[11].mxu1 }
 0x572   : > { %v1880_v30 = vrot.slane %v1879_v4, 4  ;;  %v1958_v14 = vadd.f32 %v1957_v7, %v1956_v50 }
 0x574   : > { %v1881_v10 = vadd.f32 %v1880_v30, %v1879_v4  ;;  %v1959_v32 = vrot.slane %v1958_v14, 4 }
 0x576   : > { %v1882_v16 = vrot.slane %v1881_v10, 2  ;;  %v1960_v18 = vadd.f32 %v1959_v32, %v1958_v14 }
 0x578   : > { %v1883_v33 = vadd.f32 %v1882_v16, %v1881_v10  ;;  %v1961_v34 = vrot.slane %v1960_v18, 2 }
 0x57a   : > { %v1884_v35 = vrot.slane %v1883_v33, 1  ;;  %v1962_v13 = vadd.f32 %v1961_v34, %v1960_v18 }
 0x57c   : > { %v1885_v37 = vadd.f32 %v1884_v35, %v1883_v33  ;;  %v1963_v39 = vrot.slane %v1962_v13, 1 }
 0x57e   : > { %2905 = vmatmul.mubr.f32.vlgmr.msra.gmra.mrb[16].mxu0 %v1885_v37  ;;  %v1964_v40 = vadd.f32 %v1963_v39, %v1962_v13 }
 0x57f   : > { %2943 = vmatpush3.msra.mxu0 %v3469_v38  ;;  %2944 = vmatprep.mubr.msk.f32.mxu0 %vm3203_vm0, %v3202_v1 }
 0x580   : > { %2940 = vmatmul.mubr.f32.vlgmr.msra.gmra.mrb[12].mxu1 %v1964_v40  ;;  %2947 = vmatprep.subr.mxu0 %v3202_v1 }
 0x5f3   : > { %v1529_v41 = vpop.f32.mrb[12].mxu0 }
 0x5f4   : > { %v1609_v43 = vrot.slane %v1529_v41, %v3521_v5  ;;  %v2830_v44 = vpop.f32.mrb[13].mxu0 }
 0x5f6   : > { %v1610_v45 = vsub.f32 %v3606_v20, %v1609_v43  ;;  %v1611_v46 = vsub.f32 %v3608_v22, %v1609_v43 }
 0x624   : > { %v1602_v47 = vpop.f32.mrb[14].mxu0 }
 0x625   : > { %v1615_v48 = vrot.slane %v1602_v47, %v3521_v5  ;;  %v2835_v49 = vpop.f32.mrb[15].mxu0 }
 0x627   : > { %v1616_v51 = vmul.f32 %v1615_v48, %v1610_v45  ;;  %v1617_v52 = vmul.f32 %v1615_v48, %v1611_v46 }
 0x651   : > { %v1952_v53 = vpop.f32.mrb[16].mxu0 }
 0x652   : > { %v2035_v17 = vmul.f32 0.00390625, %v1952_v53  ;;  %v2906_v55 = vpop.f32.mrb[17].mxu0 }
 0x653   : > { %v2031_v56 = vpop.f32.mrb[12].mxu1 }
 0x654   : > { %v2037_v54 = vmul.f32 %v2035_v17, %v2035_v17  ;;  %v2036_v57 = vmul.f32 0.00390625, %v2031_v56  ;;  %v2941_v58 = vpop.f32.mrb[13].mxu1  ;;  %2945 = vmatmul.mubr.msk.f32.vlgmr.msra.gmra.mrb[18].mxu0 %vm742_vm13, %v2035_v17 }
 0x655   : > { %2948 = vmatpush3.msra.mxu0 %v3469_v38  ;;  %2949 = vmatprep.mubr.msk.f32.mxu0 %vm3203_vm0, %v3202_v1 }
 0x656   : > { %v2038_v20 = vsub.f32 %v2036_v57, %v2037_v54 }
 0x658   : > { %v2039_v22 = vmax.f32 %v2038_v20, 0.0 }
 0x65a   : > { %v2040_v59 = vadd.f32 1e-05, %v2039_v22 }
 0x65c   : > { %3192 = vrsqrt.f32 %v2040_v59 }
 0x666   : > { %v3193_v60 = vpop.eup %3192 }
 0x667   : > { %2950 = vmatmul.mubr.msk.f32.vlgmr.msra.gmra.mrb[20].mxu0 %vm742_vm13, %v3193_v60 }
 0x727   : > { %v2111_v61 = vpop.f32.mrb[18].mxu0 }
 0x728   : > { %v2191_v62 = vrot.slane %v2111_v61, %v3521_v5  ;;  %v2946_v63 = vpop.f32.mrb[19].mxu0 }
 0x72a   : > { %v2192_v0 = vsub.f32 %v3732_v31, %v2191_v62  ;;  %v2193_v2 = vsub.f32 %v1873_v42, %v2191_v62 }
 0x73a   : > { %v2184_v3 = vpop.f32.mrb[20].mxu0 }
 0x73b   : > { %v2197_v38 = vrot.slane %v2184_v3, %v3521_v5  ;;  %v2951_v6 = vpop.f32.mrb[21].mxu0 }
 0x73d   : > { %v2198_v1 = vmul.f32 %v2197_v38, %v2192_v0  ;;  %v2199_v8 = vmul.f32 %v2197_v38, %v2193_v2 }
 0x73f   : > { %v2200_v9 = vadd.f32 %v2198_v1, %v1616_v51  ;;  %v2201_v11 = vadd.f32 %v2199_v8, %v1617_v52 }
 0x741   : > { %2202 = vst [vmem:[%s251_s28] sm:$0xff] %v2200_v9  ;;  %2203 = vst [vmem:[%s251_s28 + $0x8] sm:$0xff] %v2201_v11 }
 0x742 PF: > { %s16_s21 = sadd.s32 1, %s3200_s21  }
 0x743   : > { %p13_p4 = scmp.ge.s32.totalorder %s16_s21, 4  }
 0x745   :  { %15 = sbr.rel (!%p13_p4) target bundleno = 1 (0x1), region = 80 }

</bundles_post_ra>
